<compile_context>
chip_gen: v7x
topology: tpu7x:2x2x1
jax: 0.10.0
libtpu: 0.0.40
codegen_flags: <defaults>
</compile_context>

<pallas_src>
import functools

import jax
import jax.numpy as jnp
from jax.experimental import pallas as pl
from jax.experimental.pallas import tpu as pltpu


def _bilinear_matrix(in_size: int, out_size: int) -> jnp.ndarray:
    """A (out_size, in_size) with up = A @ x reproducing
    F.interpolate(mode='bilinear', align_corners=False) along one axis."""
    scale = in_size / out_size
    dst = jnp.arange(out_size, dtype=jnp.float32)
    src = jnp.maximum(scale * (dst + 0.5) - 0.5, 0.0)   # PyTorch clamps negative src
    i0 = jnp.minimum(jnp.floor(src).astype(jnp.int32), in_size - 1)
    i1 = jnp.minimum(i0 + 1, in_size - 1)
    w1 = src - i0.astype(jnp.float32)
    w0 = 1.0 - w1
    return (jax.nn.one_hot(i0, in_size, dtype=jnp.float32) * w0[:, None]
            + jax.nn.one_hot(i1, in_size, dtype=jnp.float32) * w1[:, None])


def _vmem_capacity_bytes() -> int:
    try:
        cap = getattr(pltpu.get_tpu_info(), "vmem_capacity_bytes", None)
        if cap:
            return int(cap)
    except Exception:
        pass
    return 64 * 1024 * 1024          # conservative (v7x per-TC size)


def _pick_group(ht: int, w: int) -> int:
    """Rows per width-upsample MXU issue: largest divisor of ht with r*w <= ~256."""
    target = max(1, 256 // w)
    r = 1
    for cand in range(1, min(ht, target) + 1):
        if ht % cand == 0:
            r = cand
    return r


def _working_set_bytes(ht, w, cin, cout, in_bytes, out_bytes, r) -> int:
    wo = 2 * w
    in_blk = cin * ht * w * in_bytes
    halo_blk = cin * 2 * w * in_bytes
    out_blk = cout * ht * 2 * wo * out_bytes
    z_scr = cout * (ht + 2) * w * 2                      # bf16
    u_scr = cout * (ht + 2) * wo * 4                     # f32
    weights = ((r * w) * (r * wo) * 2 + (2 * w) * (2 * wo) * 2
               + cout * cin * 2 + cout * 4)
    return 2 * (in_blk + halo_blk + out_blk + weights) + z_scr + u_scr


def _pick_row_tile(h, w, cin, cout, in_bytes, out_bytes, budget, max_rows=64) -> int:
    """Row-chunk Ht: divides H, keeps the flattened lane dim a multiple of 128
    (or full), prefers >= 2 chunks (v7x megacore), largest tile fitting budget."""
    cands = [ht for ht in range(1, h + 1)
             if h % ht == 0 and ((ht * w) % 128 == 0 or ht == h) and ht <= max_rows]
    if not cands:
        cands = [h]

    def ws(ht):
        return _working_set_bytes(ht, w, cin, cout, in_bytes, out_bytes,
                                  _pick_group(ht, w))

    split = [ht for ht in cands if h // ht >= 2]
    for pool in (split, cands):
        fitting = [ht for ht in pool if ws(ht) <= budget]
        if fitting:
            return max(fitting)
    return min(cands)


def _interp_conv_kernel(xm_ref, xh_ref, awtg_ref, awt2_ref, wf_ref, b_ref,
                        o_ref, z_scr, u_scr, *, ht, w, wo, r):
    # xm_ref  : (Cin, ht*w)        row-chunk of the input (rows flattened on lanes)
    # xh_ref  : (Cin, 2*w)         pre-gathered clamped halo rows [above | below]
    # awtg_ref: (r*w, r*wo)  bf16  block-diag width interpolation (r rows / issue)
    # awt2_ref: (2*w, 2*wo)  bf16  block-diag width interpolation for the 2 halos
    # wf_ref  : (Cout, Cin)  bf16  BN-folded 1x1 conv weight
    # b_ref   : (Cout, 1)    f32   BN-folded bias
    # o_ref   : (Cout, ht*2*wo)    output chunk; flat layout == NCHW rows [2j | 2j+1]
    # z_scr   : (Cout, (ht+2)*w)   bf16 VMEM: conv result   [rows 0..ht-1 | top | bot]
    # u_scr   : (Cout, (ht+2)*wo)  f32  VMEM: width-upsampled [rows 0..ht-1 | top | bot]
    cout = o_ref.shape[0]
    wfv = wf_ref[...]

    # 1) BN-folded 1x1 conv, batched over the whole chunk (one big MXU matmul,
    #    N = ht*w lanes) + one tiny matmul for the two halo rows.
    z_scr[:, 0:ht * w] = jnp.dot(
        wfv, xm_ref[...].astype(jnp.bfloat16),
        preferred_element_type=jnp.float32).astype(jnp.bfloat16)
    z_scr[:, ht * w:(ht + 2) * w] = jnp.dot(
        wfv, xh_ref[...].astype(jnp.bfloat16),
        preferred_element_type=jnp.float32).astype(jnp.bfloat16)

    # 2) Width 2x upsample on the MXU, r rows per issue via block-diag matrix.
    awt_g = awtg_ref[...]
    for g in range(ht // r):
        u_scr[:, g * r * wo:(g + 1) * r * wo] = jnp.dot(
            z_scr[:, g * r * w:(g + 1) * r * w], awt_g,
            preferred_element_type=jnp.float32)
    u_scr[:, ht * wo:(ht + 2) * wo] = jnp.dot(
        z_scr[:, ht * w:(ht + 2) * w], awt2_ref[...],
        preferred_element_type=jnp.float32)

    # 3) Height 2x upsample (0.25/0.75 axpy) + bias + ReLU epilogue, reading row
    #    slices from VMEM scratch (short live ranges, no rolling vreg window).
    bias_b = jnp.broadcast_to(b_ref[...], (cout, wo))          # hoisted once
    for j in range(ht):
        cur = u_scr[:, j * wo:(j + 1) * wo]
        prev = (u_scr[:, (j - 1) * wo:j * wo] if j > 0
                else u_scr[:, ht * wo:(ht + 1) * wo])          # top halo
        nxt = (u_scr[:, (j + 1) * wo:(j + 2) * wo] if j < ht - 1
               else u_scr[:, (ht + 1) * wo:(ht + 2) * wo])     # bottom halo
        even = jnp.maximum(0.25 * prev + 0.75 * cur + bias_b, 0.0)
        odd = jnp.maximum(0.75 * cur + 0.25 * nxt + bias_b, 0.0)
        base = 2 * j * wo
        o_ref[:, base:base + wo] = even.astype(o_ref.dtype)
        o_ref[:, base + wo:base + 2 * wo] = odd.astype(o_ref.dtype)


def interp_conv(x_nchw, conv_w, gamma, beta, running_mean, running_var,
                eps=1e-5, out_dtype=jnp.float32):
    """InterpConv forward: bilinear 2x upsample -> 1x1 conv -> BN(eval) -> ReLU.
    x_nchw: (N, Cin, H, W) f32 -> (N, Cout, 2H, 2W) out_dtype."""
    N, Cin, H, W = x_nchw.shape
    Cout = conv_w.shape[0]
    Ho, Wo = 2 * H, 2 * W

    in_bytes = x_nchw.dtype.itemsize
    out_bytes = jnp.dtype(out_dtype).itemsize
    cap = _vmem_capacity_bytes()
    budget = min(int(0.35 * cap), 48 * 1024 * 1024)

    Ht = _pick_row_tile(H, W, Cin, Cout, in_bytes, out_bytes, budget)
    T = H // Ht
    R = _pick_group(Ht, W)

    ws = _working_set_bytes(Ht, W, Cin, Cout, in_bytes, out_bytes, R)
    vmem_limit = int(max(32 << 20, min(2 * ws + (8 << 20), int(0.85 * cap))))

    # Fold eval-mode BatchNorm into the (bias-free) 1x1 conv; bf16 matmul operands.
    scale = gamma / jnp.sqrt(running_var + eps)
    wf = (conv_w.reshape(Cout, Cin) * scale[:, None]).astype(jnp.bfloat16)
    bf = (beta - scale * running_mean).reshape(Cout, 1).astype(jnp.float32)

    # Width interpolation matrices (entries 0 / 0.25 / 0.75 / 1.0 — exact in bf16).
    awt = _bilinear_matrix(W, Wo).T                                    # (W, Wo)
    awt_g = jnp.kron(jnp.eye(R, dtype=jnp.float32), awt).astype(jnp.bfloat16)
    awt_2 = jnp.kron(jnp.eye(2, dtype=jnp.float32), awt).astype(jnp.bfloat16)

    x_flat = x_nchw.reshape(N, Cin, H * W)                             # free NCHW view

    # Per-chunk one-row halos (clamped at the image edges), gathered once in XLA
    # so the kernel needs only two lane-dense input streams (chunk + tiny halo).
    t_idx = jnp.arange(T)
    top_idx = jnp.clip(t_idx * Ht - 1, 0, H - 1)
    bot_idx = jnp.clip((t_idx + 1) * Ht, 0, H - 1)
    halo = jnp.stack([x_nchw[:, :, top_idx, :], x_nchw[:, :, bot_idx, :]], axis=3)
    halo = jnp.transpose(halo, (0, 2, 1, 3, 4)).reshape(N, T, Cin, 2 * W)

    kernel = functools.partial(_interp_conv_kernel, ht=Ht, w=W, wo=Wo, r=R)

    out_flat = pl.pallas_call(
        kernel,
        out_shape=jax.ShapeDtypeStruct((N, Cout, Ho * Wo), out_dtype),
        grid=(N, T),
        in_specs=[
            pl.BlockSpec((None, Cin, Ht * W), lambda n, t: (n, 0, t)),
            pl.BlockSpec((None, None, Cin, 2 * W), lambda n, t: (n, t, 0, 0)),
            pl.BlockSpec((R * W, R * Wo), lambda n, t: (0, 0)),
            pl.BlockSpec((2 * W, 2 * Wo), lambda n, t: (0, 0)),
            pl.BlockSpec((Cout, Cin), lambda n, t: (0, 0)),
            pl.BlockSpec((Cout, 1), lambda n, t: (0, 0)),
        ],
        out_specs=pl.BlockSpec((None, Cout, Ht * 2 * Wo), lambda n, t: (n, 0, t)),
        scratch_shapes=[
            pltpu.VMEM((Cout, (Ht + 2) * W), jnp.bfloat16),   # conv result
            pltpu.VMEM((Cout, (Ht + 2) * Wo), jnp.float32),   # width-upsampled
        ],
        compiler_params=pltpu.CompilerParams(
            dimension_semantics=("parallel", "parallel"),
            vmem_limit_bytes=vmem_limit),
    )(x_flat, halo, awt_g, awt_2, wf, bf)

    # Free reshape back to NCHW: row j of each chunk holds [out row 2j | out row 2j+1].
    return out_flat.reshape(N, Cout, Ho, Wo)


def _reference(x, conv_w, gamma, beta, running_mean, running_var, eps=1e-5):
    """Independent pure-JAX reference: upsample -> conv1x1 -> BN(eval) -> ReLU."""
    N, Cin, H, W = x.shape
    up = jax.image.resize(x, (N, Cin, 2 * H, 2 * W), method='bilinear')
    z = jnp.einsum('kc,nchw->nkhw', conv_w, up)
    z = (z - running_mean[None, :, None, None]) / jnp.sqrt(running_var + eps)[None, :, None, None]
    z = z * gamma[None, :, None, None] + beta[None, :, None, None]
    return jnp.maximum(z, 0.0)


if __name__ == "__main__":
    N, Cin, Cout, H, W = 2, 4, 8, 16, 16

    key = jax.random.PRNGKey(0)
    kx, kw, kg, kb, km, kv = jax.random.split(key, 6)
    x = jax.random.normal(kx, (N, Cin, H, W), dtype=jnp.float32)
    conv_w = 0.3 * jax.random.normal(kw, (Cout, Cin), dtype=jnp.float32)   # 1x1 kernel
    gamma = 1.0 + 0.1 * jax.random.normal(kg, (Cout,), dtype=jnp.float32)
    beta = 0.1 * jax.random.normal(kb, (Cout,), dtype=jnp.float32)
    running_mean = 0.1 * jax.random.normal(km, (Cout,), dtype=jnp.float32)
    running_var = jax.random.uniform(kv, (Cout,), minval=0.5, maxval=1.5, dtype=jnp.float32)

    out = interp_conv(x, conv_w, gamma, beta, running_mean, running_var)
    out = jax.block_until_ready(out)

    ref = _reference(x, conv_w, gamma, beta, running_mean, running_var)
    assert out.shape == (N, Cout, 2 * H, 2 * W), out.shape
    max_err = float(jnp.max(jnp.abs(out - ref)))
    assert max_err < 5e-2, f"max abs err too large: {max_err}"  # bf16 matmul operands

    print("KERNEL_OK")
</pallas_src>

<mosaic_0001>
module attributes {stable_mosaic.version = 11 : i64} {
  func.func @_interp_conv_kernel(%arg0: i32, %arg1: i32, %arg2: memref<1x4x128xf32, #tpu.memory_space<vmem>>, %arg3: memref<1x1x4x32xf32, #tpu.memory_space<vmem>>, %arg4: memref<128x256xbf16, #tpu.memory_space<vmem>>, %arg5: memref<32x64xbf16, #tpu.memory_space<vmem>>, %arg6: memref<8x4xbf16, #tpu.memory_space<vmem>>, %arg7: memref<8x1xf32, #tpu.memory_space<vmem>>, %arg8: memref<1x8x512xf32, #tpu.memory_space<vmem>>, %arg9: memref<8x160xbf16, #tpu.memory_space<vmem>>, %arg10: memref<8x320xf32, #tpu.memory_space<vmem>>) attributes {dimension_semantics = [#tpu.dimension_semantics<parallel>, #tpu.dimension_semantics<parallel>], iteration_bounds = array<i64: 2, 2>, scalar_prefetch = 0 : i64, scratch_operands = 2 : i64, tpu.core_type = #tpu.core_type<tc>, window_params = [{transform_indices = @transform_0, window_bounds = array<i64: 1, 4, 128>}, {transform_indices = @transform_1, window_bounds = array<i64: 1, 1, 4, 32>}, {pipeline_mode = #tpu.pipeline_mode<synchronous>, transform_indices = @transform_2, window_bounds = array<i64: 128, 256>}, {pipeline_mode = #tpu.pipeline_mode<synchronous>, transform_indices = @transform_3, window_bounds = array<i64: 32, 64>}, {pipeline_mode = #tpu.pipeline_mode<synchronous>, transform_indices = @transform_4, window_bounds = array<i64: 8, 4>}, {pipeline_mode = #tpu.pipeline_mode<synchronous>, transform_indices = @transform_5, window_bounds = array<i64: 8, 1>}, {transform_indices = @transform_6, window_bounds = array<i64: 1, 8, 512>}]} {
    %c0 = arith.constant 0 : index
    %c0_0 = arith.constant 0 : index
    %0 = vector.load %arg6[%c0, %c0_0] : memref<8x4xbf16, #tpu.memory_space<vmem>>, vector<8x4xbf16>
    %c0_1 = arith.constant 0 : index
    %c0_2 = arith.constant 0 : index
    %c0_3 = arith.constant 0 : index
    %1 = vector.load %arg2[%c0_1, %c0_2, %c0_3] : memref<1x4x128xf32, #tpu.memory_space<vmem>>, vector<1x4x128xf32>
    %2 = vector.shape_cast %1 : vector<1x4x128xf32> to vector<4x128xf32>
    %3 = arith.truncf %2 : vector<4x128xf32> to vector<4x128xbf16>
    %cst = arith.constant dense<0.000000e+00> : vector<8x128xf32>
    %4 = tpu.matmul %0, %3, %cst {dimension_numbers = #tpu.dot_dimension_numbers<[1], [0], [0], [1], [0, 0, 1, 1], [], []>} : vector<8x4xbf16>, vector<4x128xbf16>, vector<8x128xf32> -> vector<8x128xf32>
    %5 = arith.truncf %4 : vector<8x128xf32> to vector<8x128xbf16>
    %c0_4 = arith.constant 0 : index
    %c0_5 = arith.constant 0 : index
    %6 = vector.load %arg9[%c0_4, %c0_5] : memref<8x160xbf16, #tpu.memory_space<vmem>>, vector<8x128xbf16>
    tpu.vector_store %arg9[%c0_4, %c0_5], %5 {strides = array<i32>} : memref<8x160xbf16, #tpu.memory_space<vmem>>, vector<8x128xbf16>,
    %c0_6 = arith.constant 0 : index
    %c0_7 = arith.constant 0 : index
    %c0_8 = arith.constant 0 : index
    %c0_9 = arith.constant 0 : index
    %7 = vector.load %arg3[%c0_6, %c0_7, %c0_8, %c0_9] : memref<1x1x4x32xf32, #tpu.memory_space<vmem>>, vector<1x1x4x32xf32>
    %8 = vector.shape_cast %7 : vector<1x1x4x32xf32> to vector<4x32xf32>
    %9 = arith.truncf %8 : vector<4x32xf32> to vector<4x32xbf16>
    %cst_10 = arith.constant dense<0.000000e+00> : vector<8x32xf32>
    %10 = tpu.matmul %0, %9, %cst_10 {dimension_numbers = #tpu.dot_dimension_numbers<[1], [0], [0], [1], [0, 0, 1, 1], [], []>} : vector<8x4xbf16>, vector<4x32xbf16>, vector<8x32xf32> -> vector<8x32xf32>
    %11 = arith.truncf %10 : vector<8x32xf32> to vector<8x32xbf16>
    %c0_11 = arith.constant 0 : index
    %c128 = arith.constant 128 : index
    %12 = vector.load %arg9[%c0_11, %c128] : memref<8x160xbf16, #tpu.memory_space<vmem>>, vector<8x32xbf16>
    tpu.vector_store %arg9[%c0_11, %c128], %11 {strides = array<i32>} : memref<8x160xbf16, #tpu.memory_space<vmem>>, vector<8x32xbf16>,
    %c0_12 = arith.constant 0 : index
    %c0_13 = arith.constant 0 : index
    %13 = vector.load %arg4[%c0_12, %c0_13] : memref<128x256xbf16, #tpu.memory_space<vmem>>, vector<128x256xbf16>
    %c0_14 = arith.constant 0 : index
    %c0_15 = arith.constant 0 : index
    %14 = vector.load %arg9[%c0_14, %c0_15] : memref<8x160xbf16, #tpu.memory_space<vmem>>, vector<8x128xbf16>
    %cst_16 = arith.constant dense<0.000000e+00> : vector<8x256xf32>
    %15 = tpu.matmul %14, %13, %cst_16 {dimension_numbers = #tpu.dot_dimension_numbers<[1], [0], [0], [1], [0, 0, 1, 1], [], []>} : vector<8x128xbf16>, vector<128x256xbf16>, vector<8x256xf32> -> vector<8x256xf32>
    %c0_17 = arith.constant 0 : index
    %c0_18 = arith.constant 0 : index
    %16 = vector.load %arg10[%c0_17, %c0_18] : memref<8x320xf32, #tpu.memory_space<vmem>>, vector<8x256xf32>
    tpu.vector_store %arg10[%c0_17, %c0_18], %15 {strides = array<i32>} : memref<8x320xf32, #tpu.memory_space<vmem>>, vector<8x256xf32>,
    %c0_19 = arith.constant 0 : index
    %c128_20 = arith.constant 128 : index
    %17 = vector.load %arg9[%c0_19, %c128_20] : memref<8x160xbf16, #tpu.memory_space<vmem>>, vector<8x32xbf16>
    %c0_21 = arith.constant 0 : index
    %c0_22 = arith.constant 0 : index
    %18 = vector.load %arg5[%c0_21, %c0_22] : memref<32x64xbf16, #tpu.memory_space<vmem>>, vector<32x64xbf16>
    %cst_23 = arith.constant dense<0.000000e+00> : vector<8x64xf32>
    %19 = tpu.matmul %17, %18, %cst_23 {dimension_numbers = #tpu.dot_dimension_numbers<[1], [0], [0], [1], [0, 0, 1, 1], [], []>} : vector<8x32xbf16>, vector<32x64xbf16>, vector<8x64xf32> -> vector<8x64xf32>
    %c0_24 = arith.constant 0 : index
    %c256 = arith.constant 256 : index
    %20 = vector.load %arg10[%c0_24, %c256] : memref<8x320xf32, #tpu.memory_space<vmem>>, vector<8x64xf32>
    tpu.vector_store %arg10[%c0_24, %c256], %19 {strides = array<i32>} : memref<8x320xf32, #tpu.memory_space<vmem>>, vector<8x64xf32>,
    %c0_25 = arith.constant 0 : index
    %c0_26 = arith.constant 0 : index
    %21 = vector.load %arg7[%c0_25, %c0_26] : memref<8x1xf32, #tpu.memory_space<vmem>>, vector<8x1xf32>
    %22 = vector.shape_cast %21 : vector<8x1xf32> to vector<8x1xf32>
    %23 = vector.broadcast %22 : vector<8x1xf32> to vector<8x32xf32>
    %c0_27 = arith.constant 0 : index
    %c0_28 = arith.constant 0 : index
    %24 = vector.load %arg10[%c0_27, %c0_28] : memref<8x320xf32, #tpu.memory_space<vmem>>, vector<8x32xf32>
    %c0_29 = arith.constant 0 : index
    %c256_30 = arith.constant 256 : index
    %25 = vector.load %arg10[%c0_29, %c256_30] : memref<8x320xf32, #tpu.memory_space<vmem>>, vector<8x32xf32>
    %c0_31 = arith.constant 0 : index
    %c32 = arith.constant 32 : index
    %26 = vector.load %arg10[%c0_31, %c32] : memref<8x320xf32, #tpu.memory_space<vmem>>, vector<8x32xf32>
    %cst_32 = arith.constant 2.500000e-01 : f32
    %27 = vector.broadcast %cst_32 : f32 to vector<8x32xf32>
    %28 = arith.mulf %27, %25 : vector<8x32xf32>
    %cst_33 = arith.constant 7.500000e-01 : f32
    %29 = vector.broadcast %cst_33 : f32 to vector<8x32xf32>
    %30 = arith.mulf %29, %24 : vector<8x32xf32>
    %31 = arith.addf %28, %30 : vector<8x32xf32>
    %32 = arith.addf %31, %23 : vector<8x32xf32>
    %cst_34 = arith.constant 0.000000e+00 : f32
    %33 = vector.broadcast %cst_34 : f32 to vector<8x32xf32>
    %34 = arith.maximumf %32, %33 : vector<8x32xf32>
    %cst_35 = arith.constant 7.500000e-01 : f32
    %35 = vector.broadcast %cst_35 : f32 to vector<8x32xf32>
    %36 = arith.mulf %35, %24 : vector<8x32xf32>
    %cst_36 = arith.constant 2.500000e-01 : f32
    %37 = vector.broadcast %cst_36 : f32 to vector<8x32xf32>
    %38 = arith.mulf %37, %26 : vector<8x32xf32>
    %39 = arith.addf %36, %38 : vector<8x32xf32>
    %40 = arith.addf %39, %23 : vector<8x32xf32>
    %cst_37 = arith.constant 0.000000e+00 : f32
    %41 = vector.broadcast %cst_37 : f32 to vector<8x32xf32>
    %42 = arith.maximumf %40, %41 : vector<8x32xf32>
    %c0_38 = arith.constant 0 : index
    %c0_39 = arith.constant 0 : index
    %c0_40 = arith.constant 0 : index
    %43 = vector.load %arg8[%c0_38, %c0_39, %c0_40] : memref<1x8x512xf32, #tpu.memory_space<vmem>>, vector<1x8x32xf32>
    %44 = vector.shape_cast %43 : vector<1x8x32xf32> to vector<8x32xf32>
    %45 = vector.shape_cast %34 : vector<8x32xf32> to vector<1x8x32xf32>
    tpu.vector_store %arg8[%c0_38, %c0_39, %c0_40], %45 {strides = array<i32>} : memref<1x8x512xf32, #tpu.memory_space<vmem>>, vector<1x8x32xf32>,
    %c0_41 = arith.constant 0 : index
    %c0_42 = arith.constant 0 : index
    %c32_43 = arith.constant 32 : index
    %46 = vector.load %arg8[%c0_41, %c0_42, %c32_43] : memref<1x8x512xf32, #tpu.memory_space<vmem>>, vector<1x8x32xf32>
    %47 = vector.shape_cast %46 : vector<1x8x32xf32> to vector<8x32xf32>
    %48 = vector.shape_cast %42 : vector<8x32xf32> to vector<1x8x32xf32>
    tpu.vector_store %arg8[%c0_41, %c0_42, %c32_43], %48 {strides = array<i32>} : memref<1x8x512xf32, #tpu.memory_space<vmem>>, vector<1x8x32xf32>,
    %c0_44 = arith.constant 0 : index
    %c32_45 = arith.constant 32 : index
    %49 = vector.load %arg10[%c0_44, %c32_45] : memref<8x320xf32, #tpu.memory_space<vmem>>, vector<8x32xf32>
    %c0_46 = arith.constant 0 : index
    %c0_47 = arith.constant 0 : index
    %50 = vector.load %arg10[%c0_46, %c0_47] : memref<8x320xf32, #tpu.memory_space<vmem>>, vector<8x32xf32>
    %c0_48 = arith.constant 0 : index
    %c64 = arith.constant 64 : index
    %51 = vector.load %arg10[%c0_48, %c64] : memref<8x320xf32, #tpu.memory_space<vmem>>, vector<8x32xf32>
    %cst_49 = arith.constant 2.500000e-01 : f32
    %52 = vector.broadcast %cst_49 : f32 to vector<8x32xf32>
    %53 = arith.mulf %52, %50 : vector<8x32xf32>
    %cst_50 = arith.constant 7.500000e-01 : f32
    %54 = vector.broadcast %cst_50 : f32 to vector<8x32xf32>
    %55 = arith.mulf %54, %49 : vector<8x32xf32>
    %56 = arith.addf %53, %55 : vector<8x32xf32>
    %57 = arith.addf %56, %23 : vector<8x32xf32>
    %cst_51 = arith.constant 0.000000e+00 : f32
    %58 = vector.broadcast %cst_51 : f32 to vector<8x32xf32>
    %59 = arith.maximumf %57, %58 : vector<8x32xf32>
    %cst_52 = arith.constant 7.500000e-01 : f32
    %60 = vector.broadcast %cst_52 : f32 to vector<8x32xf32>
    %61 = arith.mulf %60, %49 : vector<8x32xf32>
    %cst_53 = arith.constant 2.500000e-01 : f32
    %62 = vector.broadcast %cst_53 : f32 to vector<8x32xf32>
    %63 = arith.mulf %62, %51 : vector<8x32xf32>
    %64 = arith.addf %61, %63 : vector<8x32xf32>
    %65 = arith.addf %64, %23 : vector<8x32xf32>
    %cst_54 = arith.constant 0.000000e+00 : f32
    %66 = vector.broadcast %cst_54 : f32 to vector<8x32xf32>
    %67 = arith.maximumf %65, %66 : vector<8x32xf32>
    %c0_55 = arith.constant 0 : index
    %c0_56 = arith.constant 0 : index
    %c64_57 = arith.constant 64 : index
    %68 = vector.load %arg8[%c0_55, %c0_56, %c64_57] : memref<1x8x512xf32, #tpu.memory_space<vmem>>, vector<1x8x32xf32>
    %69 = vector.shape_cast %68 : vector<1x8x32xf32> to vector<8x32xf32>
    %70 = vector.shape_cast %59 : vector<8x32xf32> to vector<1x8x32xf32>
    tpu.vector_store %arg8[%c0_55, %c0_56, %c64_57], %70 {strides = array<i32>} : memref<1x8x512xf32, #tpu.memory_space<vmem>>, vector<1x8x32xf32>,
    %c0_58 = arith.constant 0 : index
    %c0_59 = arith.constant 0 : index
    %c96 = arith.constant 96 : index
    %71 = vector.load %arg8[%c0_58, %c0_59, %c96] : memref<1x8x512xf32, #tpu.memory_space<vmem>>, vector<1x8x32xf32>
    %72 = vector.shape_cast %71 : vector<1x8x32xf32> to vector<8x32xf32>
    %73 = vector.shape_cast %67 : vector<8x32xf32> to vector<1x8x32xf32>
    tpu.vector_store %arg8[%c0_58, %c0_59, %c96], %73 {strides = array<i32>} : memref<1x8x512xf32, #tpu.memory_space<vmem>>, vector<1x8x32xf32>,
    %c0_60 = arith.constant 0 : index
    %c64_61 = arith.constant 64 : index
    %74 = vector.load %arg10[%c0_60, %c64_61] : memref<8x320xf32, #tpu.memory_space<vmem>>, vector<8x32xf32>
    %c0_62 = arith.constant 0 : index
    %c32_63 = arith.constant 32 : index
    %75 = vector.load %arg10[%c0_62, %c32_63] : memref<8x320xf32, #tpu.memory_space<vmem>>, vector<8x32xf32>
    %c0_64 = arith.constant 0 : index
    %c96_65 = arith.constant 96 : index
    %76 = vector.load %arg10[%c0_64, %c96_65] : memref<8x320xf32, #tpu.memory_space<vmem>>, vector<8x32xf32>
    %cst_66 = arith.constant 2.500000e-01 : f32
    %77 = vector.broadcast %cst_66 : f32 to vector<8x32xf32>
    %78 = arith.mulf %77, %75 : vector<8x32xf32>
    %cst_67 = arith.constant 7.500000e-01 : f32
    %79 = vector.broadcast %cst_67 : f32 to vector<8x32xf32>
    %80 = arith.mulf %79, %74 : vector<8x32xf32>
    %81 = arith.addf %78, %80 : vector<8x32xf32>
    %82 = arith.addf %81, %23 : vector<8x32xf32>
    %cst_68 = arith.constant 0.000000e+00 : f32
    %83 = vector.broadcast %cst_68 : f32 to vector<8x32xf32>
    %84 = arith.maximumf %82, %83 : vector<8x32xf32>
    %cst_69 = arith.constant 7.500000e-01 : f32
    %85 = vector.broadcast %cst_69 : f32 to vector<8x32xf32>
    %86 = arith.mulf %85, %74 : vector<8x32xf32>
    %cst_70 = arith.constant 2.500000e-01 : f32
    %87 = vector.broadcast %cst_70 : f32 to vector<8x32xf32>
    %88 = arith.mulf %87, %76 : vector<8x32xf32>
    %89 = arith.addf %86, %88 : vector<8x32xf32>
    %90 = arith.addf %89, %23 : vector<8x32xf32>
    %cst_71 = arith.constant 0.000000e+00 : f32
    %91 = vector.broadcast %cst_71 : f32 to vector<8x32xf32>
    %92 = arith.maximumf %90, %91 : vector<8x32xf32>
    %c0_72 = arith.constant 0 : index
    %c0_73 = arith.constant 0 : index
    %c128_74 = arith.constant 128 : index
    %93 = vector.load %arg8[%c0_72, %c0_73, %c128_74] : memref<1x8x512xf32, #tpu.memory_space<vmem>>, vector<1x8x32xf32>
    %94 = vector.shape_cast %93 : vector<1x8x32xf32> to vector<8x32xf32>
    %95 = vector.shape_cast %84 : vector<8x32xf32> to vector<1x8x32xf32>
    tpu.vector_store %arg8[%c0_72, %c0_73, %c128_74], %95 {strides = array<i32>} : memref<1x8x512xf32, #tpu.memory_space<vmem>>, vector<1x8x32xf32>,
    %c0_75 = arith.constant 0 : index
    %c0_76 = arith.constant 0 : index
    %c160 = arith.constant 160 : index
    %96 = vector.load %arg8[%c0_75, %c0_76, %c160] : memref<1x8x512xf32, #tpu.memory_space<vmem>>, vector<1x8x32xf32>
    %97 = vector.shape_cast %96 : vector<1x8x32xf32> to vector<8x32xf32>
    %98 = vector.shape_cast %92 : vector<8x32xf32> to vector<1x8x32xf32>
    tpu.vector_store %arg8[%c0_75, %c0_76, %c160], %98 {strides = array<i32>} : memref<1x8x512xf32, #tpu.memory_space<vmem>>, vector<1x8x32xf32>,
    %c0_77 = arith.constant 0 : index
    %c96_78 = arith.constant 96 : index
    %99 = vector.load %arg10[%c0_77, %c96_78] : memref<8x320xf32, #tpu.memory_space<vmem>>, vector<8x32xf32>
    %c0_79 = arith.constant 0 : index
    %c64_80 = arith.constant 64 : index
    %100 = vector.load %arg10[%c0_79, %c64_80] : memref<8x320xf32, #tpu.memory_space<vmem>>, vector<8x32xf32>
    %c0_81 = arith.constant 0 : index
    %c128_82 = arith.constant 128 : index
    %101 = vector.load %arg10[%c0_81, %c128_82] : memref<8x320xf32, #tpu.memory_space<vmem>>, vector<8x32xf32>
    %cst_83 = arith.constant 2.500000e-01 : f32
    %102 = vector.broadcast %cst_83 : f32 to vector<8x32xf32>
    %103 = arith.mulf %102, %100 : vector<8x32xf32>
    %cst_84 = arith.constant 7.500000e-01 : f32
    %104 = vector.broadcast %cst_84 : f32 to vector<8x32xf32>
    %105 = arith.mulf %104, %99 : vector<8x32xf32>
    %106 = arith.addf %103, %105 : vector<8x32xf32>
    %107 = arith.addf %106, %23 : vector<8x32xf32>
    %cst_85 = arith.constant 0.000000e+00 : f32
    %108 = vector.broadcast %cst_85 : f32 to vector<8x32xf32>
    %109 = arith.maximumf %107, %108 : vector<8x32xf32>
    %cst_86 = arith.constant 7.500000e-01 : f32
    %110 = vector.broadcast %cst_86 : f32 to vector<8x32xf32>
    %111 = arith.mulf %110, %99 : vector<8x32xf32>
    %cst_87 = arith.constant 2.500000e-01 : f32
    %112 = vector.broadcast %cst_87 : f32 to vector<8x32xf32>
    %113 = arith.mulf %112, %101 : vector<8x32xf32>
    %114 = arith.addf %111, %113 : vector<8x32xf32>
    %115 = arith.addf %114, %23 : vector<8x32xf32>
    %cst_88 = arith.constant 0.000000e+00 : f32
    %116 = vector.broadcast %cst_88 : f32 to vector<8x32xf32>
    %117 = arith.maximumf %115, %116 : vector<8x32xf32>
    %c0_89 = arith.constant 0 : index
    %c0_90 = arith.constant 0 : index
    %c192 = arith.constant 192 : index
    %118 = vector.load %arg8[%c0_89, %c0_90, %c192] : memref<1x8x512xf32, #tpu.memory_space<vmem>>, vector<1x8x32xf32>
    %119 = vector.shape_cast %118 : vector<1x8x32xf32> to vector<8x32xf32>
    %120 = vector.shape_cast %109 : vector<8x32xf32> to vector<1x8x32xf32>
    tpu.vector_store %arg8[%c0_89, %c0_90, %c192], %120 {strides = array<i32>} : memref<1x8x512xf32, #tpu.memory_space<vmem>>, vector<1x8x32xf32>,
    %c0_91 = arith.constant 0 : index
    %c0_92 = arith.constant 0 : index
    %c224 = arith.constant 224 : index
    %121 = vector.load %arg8[%c0_91, %c0_92, %c224] : memref<1x8x512xf32, #tpu.memory_space<vmem>>, vector<1x8x32xf32>
    %122 = vector.shape_cast %121 : vector<1x8x32xf32> to vector<8x32xf32>
    %123 = vector.shape_cast %117 : vector<8x32xf32> to vector<1x8x32xf32>
    tpu.vector_store %arg8[%c0_91, %c0_92, %c224], %123 {strides = array<i32>} : memref<1x8x512xf32, #tpu.memory_space<vmem>>, vector<1x8x32xf32>,
    %c0_93 = arith.constant 0 : index
    %c128_94 = arith.constant 128 : index
    %124 = vector.load %arg10[%c0_93, %c128_94] : memref<8x320xf32, #tpu.memory_space<vmem>>, vector<8x32xf32>
    %c0_95 = arith.constant 0 : index
    %c96_96 = arith.constant 96 : index
    %125 = vector.load %arg10[%c0_95, %c96_96] : memref<8x320xf32, #tpu.memory_space<vmem>>, vector<8x32xf32>
    %c0_97 = arith.constant 0 : index
    %c160_98 = arith.constant 160 : index
    %126 = vector.load %arg10[%c0_97, %c160_98] : memref<8x320xf32, #tpu.memory_space<vmem>>, vector<8x32xf32>
    %cst_99 = arith.constant 2.500000e-01 : f32
    %127 = vector.broadcast %cst_99 : f32 to vector<8x32xf32>
    %128 = arith.mulf %127, %125 : vector<8x32xf32>
    %cst_100 = arith.constant 7.500000e-01 : f32
    %129 = vector.broadcast %cst_100 : f32 to vector<8x32xf32>
    %130 = arith.mulf %129, %124 : vector<8x32xf32>
    %131 = arith.addf %128, %130 : vector<8x32xf32>
    %132 = arith.addf %131, %23 : vector<8x32xf32>
    %cst_101 = arith.constant 0.000000e+00 : f32
    %133 = vector.broadcast %cst_101 : f32 to vector<8x32xf32>
    %134 = arith.maximumf %132, %133 : vector<8x32xf32>
    %cst_102 = arith.constant 7.500000e-01 : f32
    %135 = vector.broadcast %cst_102 : f32 to vector<8x32xf32>
    %136 = arith.mulf %135, %124 : vector<8x32xf32>
    %cst_103 = arith.constant 2.500000e-01 : f32
    %137 = vector.broadcast %cst_103 : f32 to vector<8x32xf32>
    %138 = arith.mulf %137, %126 : vector<8x32xf32>
    %139 = arith.addf %136, %138 : vector<8x32xf32>
    %140 = arith.addf %139, %23 : vector<8x32xf32>
    %cst_104 = arith.constant 0.000000e+00 : f32
    %141 = vector.broadcast %cst_104 : f32 to vector<8x32xf32>
    %142 = arith.maximumf %140, %141 : vector<8x32xf32>
    %c0_105 = arith.constant 0 : index
    %c0_106 = arith.constant 0 : index
    %c256_107 = arith.constant 256 : index
    %143 = vector.load %arg8[%c0_105, %c0_106, %c256_107] : memref<1x8x512xf32, #tpu.memory_space<vmem>>, vector<1x8x32xf32>
    %144 = vector.shape_cast %143 : vector<1x8x32xf32> to vector<8x32xf32>
    %145 = vector.shape_cast %134 : vector<8x32xf32> to vector<1x8x32xf32>
    tpu.vector_store %arg8[%c0_105, %c0_106, %c256_107], %145 {strides = array<i32>} : memref<1x8x512xf32, #tpu.memory_space<vmem>>, vector<1x8x32xf32>,
    %c0_108 = arith.constant 0 : index
    %c0_109 = arith.constant 0 : index
    %c288 = arith.constant 288 : index
    %146 = vector.load %arg8[%c0_108, %c0_109, %c288] : memref<1x8x512xf32, #tpu.memory_space<vmem>>, vector<1x8x32xf32>
    %147 = vector.shape_cast %146 : vector<1x8x32xf32> to vector<8x32xf32>
    %148 = vector.shape_cast %142 : vector<8x32xf32> to vector<1x8x32xf32>
    tpu.vector_store %arg8[%c0_108, %c0_109, %c288], %148 {strides = array<i32>} : memref<1x8x512xf32, #tpu.memory_space<vmem>>, vector<1x8x32xf32>,
    %c0_110 = arith.constant 0 : index
    %c160_111 = arith.constant 160 : index
    %149 = vector.load %arg10[%c0_110, %c160_111] : memref<8x320xf32, #tpu.memory_space<vmem>>, vector<8x32xf32>
    %c0_112 = arith.constant 0 : index
    %c128_113 = arith.constant 128 : index
    %150 = vector.load %arg10[%c0_112, %c128_113] : memref<8x320xf32, #tpu.memory_space<vmem>>, vector<8x32xf32>
    %c0_114 = arith.constant 0 : index
    %c192_115 = arith.constant 192 : index
    %151 = vector.load %arg10[%c0_114, %c192_115] : memref<8x320xf32, #tpu.memory_space<vmem>>, vector<8x32xf32>
    %cst_116 = arith.constant 2.500000e-01 : f32
    %152 = vector.broadcast %cst_116 : f32 to vector<8x32xf32>
    %153 = arith.mulf %152, %150 : vector<8x32xf32>
    %cst_117 = arith.constant 7.500000e-01 : f32
    %154 = vector.broadcast %cst_117 : f32 to vector<8x32xf32>
    %155 = arith.mulf %154, %149 : vector<8x32xf32>
    %156 = arith.addf %153, %155 : vector<8x32xf32>
    %157 = arith.addf %156, %23 : vector<8x32xf32>
    %cst_118 = arith.constant 0.000000e+00 : f32
    %158 = vector.broadcast %cst_118 : f32 to vector<8x32xf32>
    %159 = arith.maximumf %157, %158 : vector<8x32xf32>
    %cst_119 = arith.constant 7.500000e-01 : f32
    %160 = vector.broadcast %cst_119 : f32 to vector<8x32xf32>
    %161 = arith.mulf %160, %149 : vector<8x32xf32>
    %cst_120 = arith.constant 2.500000e-01 : f32
    %162 = vector.broadcast %cst_120 : f32 to vector<8x32xf32>
    %163 = arith.mulf %162, %151 : vector<8x32xf32>
    %164 = arith.addf %161, %163 : vector<8x32xf32>
    %165 = arith.addf %164, %23 : vector<8x32xf32>
    %cst_121 = arith.constant 0.000000e+00 : f32
    %166 = vector.broadcast %cst_121 : f32 to vector<8x32xf32>
    %167 = arith.maximumf %165, %166 : vector<8x32xf32>
    %c0_122 = arith.constant 0 : index
    %c0_123 = arith.constant 0 : index
    %c320 = arith.constant 320 : index
    %168 = vector.load %arg8[%c0_122, %c0_123, %c320] : memref<1x8x512xf32, #tpu.memory_space<vmem>>, vector<1x8x32xf32>
    %169 = vector.shape_cast %168 : vector<1x8x32xf32> to vector<8x32xf32>
    %170 = vector.shape_cast %159 : vector<8x32xf32> to vector<1x8x32xf32>
    tpu.vector_store %arg8[%c0_122, %c0_123, %c320], %170 {strides = array<i32>} : memref<1x8x512xf32, #tpu.memory_space<vmem>>, vector<1x8x32xf32>,
    %c0_124 = arith.constant 0 : index
    %c0_125 = arith.constant 0 : index
    %c352 = arith.constant 352 : index
    %171 = vector.load %arg8[%c0_124, %c0_125, %c352] : memref<1x8x512xf32, #tpu.memory_space<vmem>>, vector<1x8x32xf32>
    %172 = vector.shape_cast %171 : vector<1x8x32xf32> to vector<8x32xf32>
    %173 = vector.shape_cast %167 : vector<8x32xf32> to vector<1x8x32xf32>
    tpu.vector_store %arg8[%c0_124, %c0_125, %c352], %173 {strides = array<i32>} : memref<1x8x512xf32, #tpu.memory_space<vmem>>, vector<1x8x32xf32>,
    %c0_126 = arith.constant 0 : index
    %c192_127 = arith.constant 192 : index
    %174 = vector.load %arg10[%c0_126, %c192_127] : memref<8x320xf32, #tpu.memory_space<vmem>>, vector<8x32xf32>
    %c0_128 = arith.constant 0 : index
    %c160_129 = arith.constant 160 : index
    %175 = vector.load %arg10[%c0_128, %c160_129] : memref<8x320xf32, #tpu.memory_space<vmem>>, vector<8x32xf32>
    %c0_130 = arith.constant 0 : index
    %c224_131 = arith.constant 224 : index
    %176 = vector.load %arg10[%c0_130, %c224_131] : memref<8x320xf32, #tpu.memory_space<vmem>>, vector<8x32xf32>
    %cst_132 = arith.constant 2.500000e-01 : f32
    %177 = vector.broadcast %cst_132 : f32 to vector<8x32xf32>
    %178 = arith.mulf %177, %175 : vector<8x32xf32>
    %cst_133 = arith.constant 7.500000e-01 : f32
    %179 = vector.broadcast %cst_133 : f32 to vector<8x32xf32>
    %180 = arith.mulf %179, %174 : vector<8x32xf32>
    %181 = arith.addf %178, %180 : vector<8x32xf32>
    %182 = arith.addf %181, %23 : vector<8x32xf32>
    %cst_134 = arith.constant 0.000000e+00 : f32
    %183 = vector.broadcast %cst_134 : f32 to vector<8x32xf32>
    %184 = arith.maximumf %182, %183 : vector<8x32xf32>
    %cst_135 = arith.constant 7.500000e-01 : f32
    %185 = vector.broadcast %cst_135 : f32 to vector<8x32xf32>
    %186 = arith.mulf %185, %174 : vector<8x32xf32>
    %cst_136 = arith.constant 2.500000e-01 : f32
    %187 = vector.broadcast %cst_136 : f32 to vector<8x32xf32>
    %188 = arith.mulf %187, %176 : vector<8x32xf32>
    %189 = arith.addf %186, %188 : vector<8x32xf32>
    %190 = arith.addf %189, %23 : vector<8x32xf32>
    %cst_137 = arith.constant 0.000000e+00 : f32
    %191 = vector.broadcast %cst_137 : f32 to vector<8x32xf32>
    %192 = arith.maximumf %190, %191 : vector<8x32xf32>
    %c0_138 = arith.constant 0 : index
    %c0_139 = arith.constant 0 : index
    %c384 = arith.constant 384 : index
    %193 = vector.load %arg8[%c0_138, %c0_139, %c384] : memref<1x8x512xf32, #tpu.memory_space<vmem>>, vector<1x8x32xf32>
    %194 = vector.shape_cast %193 : vector<1x8x32xf32> to vector<8x32xf32>
    %195 = vector.shape_cast %184 : vector<8x32xf32> to vector<1x8x32xf32>
    tpu.vector_store %arg8[%c0_138, %c0_139, %c384], %195 {strides = array<i32>} : memref<1x8x512xf32, #tpu.memory_space<vmem>>, vector<1x8x32xf32>,
    %c0_140 = arith.constant 0 : index
    %c0_141 = arith.constant 0 : index
    %c416 = arith.constant 416 : index
    %196 = vector.load %arg8[%c0_140, %c0_141, %c416] : memref<1x8x512xf32, #tpu.memory_space<vmem>>, vector<1x8x32xf32>
    %197 = vector.shape_cast %196 : vector<1x8x32xf32> to vector<8x32xf32>
    %198 = vector.shape_cast %192 : vector<8x32xf32> to vector<1x8x32xf32>
    tpu.vector_store %arg8[%c0_140, %c0_141, %c416], %198 {strides = array<i32>} : memref<1x8x512xf32, #tpu.memory_space<vmem>>, vector<1x8x32xf32>,
    %c0_142 = arith.constant 0 : index
    %c224_143 = arith.constant 224 : index
    %199 = vector.load %arg10[%c0_142, %c224_143] : memref<8x320xf32, #tpu.memory_space<vmem>>, vector<8x32xf32>
    %c0_144 = arith.constant 0 : index
    %c192_145 = arith.constant 192 : index
    %200 = vector.load %arg10[%c0_144, %c192_145] : memref<8x320xf32, #tpu.memory_space<vmem>>, vector<8x32xf32>
    %c0_146 = arith.constant 0 : index
    %c288_147 = arith.constant 288 : index
    %201 = vector.load %arg10[%c0_146, %c288_147] : memref<8x320xf32, #tpu.memory_space<vmem>>, vector<8x32xf32>
    %cst_148 = arith.constant 2.500000e-01 : f32
    %202 = vector.broadcast %cst_148 : f32 to vector<8x32xf32>
    %203 = arith.mulf %202, %200 : vector<8x32xf32>
    %cst_149 = arith.constant 7.500000e-01 : f32
    %204 = vector.broadcast %cst_149 : f32 to vector<8x32xf32>
    %205 = arith.mulf %204, %199 : vector<8x32xf32>
    %206 = arith.addf %203, %205 : vector<8x32xf32>
    %207 = arith.addf %206, %23 : vector<8x32xf32>
    %cst_150 = arith.constant 0.000000e+00 : f32
    %208 = vector.broadcast %cst_150 : f32 to vector<8x32xf32>
    %209 = arith.maximumf %207, %208 : vector<8x32xf32>
    %cst_151 = arith.constant 7.500000e-01 : f32
    %210 = vector.broadcast %cst_151 : f32 to vector<8x32xf32>
    %211 = arith.mulf %210, %199 : vector<8x32xf32>
    %cst_152 = arith.constant 2.500000e-01 : f32
    %212 = vector.broadcast %cst_152 : f32 to vector<8x32xf32>
    %213 = arith.mulf %212, %201 : vector<8x32xf32>
    %214 = arith.addf %211, %213 : vector<8x32xf32>
    %215 = arith.addf %214, %23 : vector<8x32xf32>
    %cst_153 = arith.constant 0.000000e+00 : f32
    %216 = vector.broadcast %cst_153 : f32 to vector<8x32xf32>
    %217 = arith.maximumf %215, %216 : vector<8x32xf32>
    %c0_154 = arith.constant 0 : index
    %c0_155 = arith.constant 0 : index
    %c448 = arith.constant 448 : index
    %218 = vector.load %arg8[%c0_154, %c0_155, %c448] : memref<1x8x512xf32, #tpu.memory_space<vmem>>, vector<1x8x32xf32>
    %219 = vector.shape_cast %218 : vector<1x8x32xf32> to vector<8x32xf32>
    %220 = vector.shape_cast %209 : vector<8x32xf32> to vector<1x8x32xf32>
    tpu.vector_store %arg8[%c0_154, %c0_155, %c448], %220 {strides = array<i32>} : memref<1x8x512xf32, #tpu.memory_space<vmem>>, vector<1x8x32xf32>,
    %c0_156 = arith.constant 0 : index
    %c0_157 = arith.constant 0 : index
    %c480 = arith.constant 480 : index
    %221 = vector.load %arg8[%c0_156, %c0_157, %c480] : memref<1x8x512xf32, #tpu.memory_space<vmem>>, vector<1x8x32xf32>
    %222 = vector.shape_cast %221 : vector<1x8x32xf32> to vector<8x32xf32>
    %223 = vector.shape_cast %217 : vector<8x32xf32> to vector<1x8x32xf32>
    tpu.vector_store %arg8[%c0_156, %c0_157, %c480], %223 {strides = array<i32>} : memref<1x8x512xf32, #tpu.memory_space<vmem>>, vector<1x8x32xf32>,
    return
  }
  func.func @transform_0(%arg0: i32, %arg1: i32) -> (i32, i32, i32) {
    %c0_i32 = arith.constant 0 : i32
    %c0_i32_0 = arith.constant 0 : i32
    return %arg0, %c0_i32, %arg1 : i32, i32, i32
  }
  func.func @transform_1(%arg0: i32, %arg1: i32) -> (i32, i32, i32, i32) {
    %c0_i32 = arith.constant 0 : i32
    %c0_i32_0 = arith.constant 0 : i32
    %c0_i32_1 = arith.constant 0 : i32
    return %arg0, %arg1, %c0_i32, %c0_i32_0 : i32, i32, i32, i32
  }
  func.func @transform_2(%arg0: i32, %arg1: i32) -> (i32, i32) {
    %c0_i32 = arith.constant 0 : i32
    %c0_i32_0 = arith.constant 0 : i32
    %c0_i32_1 = arith.constant 0 : i32
    return %c0_i32, %c0_i32_0 : i32, i32
  }
  func.func @transform_3(%arg0: i32, %arg1: i32) -> (i32, i32) {
    %c0_i32 = arith.constant 0 : i32
    %c0_i32_0 = arith.constant 0 : i32
    %c0_i32_1 = arith.constant 0 : i32
    return %c0_i32, %c0_i32_0 : i32, i32
  }
  func.func @transform_4(%arg0: i32, %arg1: i32) -> (i32, i32) {
    %c0_i32 = arith.constant 0 : i32
    %c0_i32_0 = arith.constant 0 : i32
    %c0_i32_1 = arith.constant 0 : i32
    return %c0_i32, %c0_i32_0 : i32, i32
  }
  func.func @transform_5(%arg0: i32, %arg1: i32) -> (i32, i32) {
    %c0_i32 = arith.constant 0 : i32
    %c0_i32_0 = arith.constant 0 : i32
    %c0_i32_1 = arith.constant 0 : i32
    return %c0_i32, %c0_i32_0 : i32, i32
  }
  func.func @transform_6(%arg0: i32, %arg1: i32) -> (i32, i32, i32) {
    %c0_i32 = arith.constant 0 : i32
    %c0_i32_0 = arith.constant 0 : i32
    return %arg0, %c0_i32, %arg1 : i32, i32, i32
  }
}

</mosaic_0001>

<bundles_post_ra>
// kernel: tpu_custom_call.1
= control target key start
LH: loop header
LB: loop body
LE: loop exit
PB: predicated region body
PF: predicated region fallthrough
CT: control target
= control target key end

     0   :  { %s1854_s0 = inlined_call_operand.hbm [shape: f32[2,4,256], index: 0, kind: input, shape index: {}]   ;;  %s1855_s1 = inlined_call_operand.vmem [shape: f32[2,2,4,32], index: 1, kind: input, shape index: {}]   ;;  %s1856_s2 = inlined_call_operand.hbm [shape: bf16[128,256], index: 2, kind: input, shape index: {}]   ;;  %s1857_s3 = inlined_call_operand.hbm [shape: bf16[32,64], index: 3, kind: input, shape index: {}]   ;;  %s1858_s4 = inlined_call_operand.vmem [shape: bf16[8,4], index: 4, kind: input, shape index: {}]   ;;  %s1859_s5 = inlined_call_operand.vmem [shape: f32[8,1], index: 5, kind: input, shape index: {}]   ;;  %s1860_s6 = inlined_call_operand.hbm [shape: f32[2,8,1024], index: 6, kind: output, shape index: {}]  }
   0x1   :  { %1872 = sst [smem:[#allocation18_spill]] %s1856_s2 }
   0x2   :  { %1873 = sst [smem:[#allocation19_spill]] %s1857_s3 }
   0x3   :  { %1874 = sst [smem:[#allocation20_spill]] %s1860_s6 }
   0x4   :  { %11 = vsyncpa [#allocation5], 0 }
   0x5   :  { %13 = vsyncpa [#allocation5 + $0x1], 0 }
   0x6   :  { %14 = vsyncpa [#allocation8], 0 }
   0x7   :  { %15 = vsyncpa [#allocation6], 0 }
   0x8   :  { %17 = vsyncpa [#allocation6 + $0x1], 0  ;;  %s1444_s21 = smov 0   ;;  %s1446_s22 = smov 0  }
   0x9   :  { %s1448_s23 = smov 0   ;;  %s1450_s24 = smov 0  }
   0xa   :  { %s1452_s25 = smov 0   ;;  %s1454_s26 = smov 0  }
   0xb   :  { %s1456_s27 = smov 0   ;;  %s1458_s28 = smov 0  }
   0xc LB: > { %1875 = sst [smem:[#allocation14_spill]] %s1365_s21  ;;  %s1865_s29 = sadd.s32 4294967295, %s1393_s28   ;;  %s1393_s28 = sphi %s1458_s28, %s23_s28   ;;  %s1389_s27 = sphi %s1456_s27, %s1905_s27   ;;  %s1385_s26 = sphi %s1454_s26, %s1904_s26   ;;  %s1381_s25 = sphi %s1452_s25, %s1903_s25   ;;  %s1377_s24 = sphi %s1450_s24, %s1902_s24   ;;  %s1373_s23 = sphi %s1448_s23, %s1901_s23   ;;  %s1369_s22 = sphi %s1446_s22, %s1900_s22   ;;  %s1365_s21 = sphi %s1444_s21, %s1899_s21  }
   0xd   : > { %s1001_s30 = sadd.s32 4294967294, %s1393_s28   ;;  %p57_p0 = scmp.ne.s32.totalorder %s1369_s22, %s1365_s21 }
   0xe   : > { %p1490_p1 = scmp.eq.s32.totalorder %s1865_s29, 0  ;;  %p201_p2 = scmp.eq.s32.totalorder %s1001_s30, 3 }
   0xf   : > { %p1002_p4 = scmp.ge.s32.totalorder %s1393_s28, 1  ;;  %p208_p6 = scmp.lt.s32.totalorder %s1393_s28, 5 }
  0x10   : > { %s1876_s7 = scalar_select %p1490_p1, 1, 0 }
  0x11   : > { %p1496_p3 = por %p1490_p1, %p57_p0  ;;  %p1501_p5 = por %p201_p2, %p57_p0 }
  0x12   : > { %p1506_p7 = pnand %p1002_p4, %p208_p6  ;;  %s1395_s11 = smov [#allocation7]  }
  0x13   : > { %s1877_s8 = scalar_select %p1496_p3, 1, 0 }
  0x14   : > { %s1878_s9 = scalar_select %p1501_p5, 1, 0 }
  0x15   : > { %s1880_s10 = scalar_select %p1506_p7, 1, 0 }
  0x16   : > { %1879 = sst [smem:[#allocation15_spill]] %s1878_s9  ;;  %s220_s12 = sshll.u32 %s1395_s11, 4  ;;  %s221_s12 = int_to_ptr.vmem [resolvable:$true] %s220_s12 }
  0x17   : > { %p1082_p8 = pneg %p1506_p7  ;;  %s1396_s14 = smov [#allocation9]  }
  0x18   : > { %s233_s15 = sshll.u32 %s1396_s14, 4  ;;  %s1882_s2 = sld [smem:[#allocation18_spill]]  ;;  %s1518_s15 = int_to_ptr.vmem [resolvable:$true] %s233_s15 }
  0x19   : > { %p1514_p9 = pnand %p1082_p8, %p1490_p1 }
  0x1b   : > { %p1207_p11 = pneg %p1514_p9 }
  0x1e   : > { %s1205_s18 = scalar_lea.hbm %s1882_s2, 2048 }
  0x1f   : > { %p1206_p10 = scmp.ne.s32.totalorder %s1882_s2, %s1205_s18  ;;  %p1212_p0 = scmp.lt.u32.totalorder %s1205_s18, %s1882_s2 }
  0x21   : > { %p1208_p12 = pnand %p1207_p11, %p1206_p10 }
  0x23   : > { %p1209_p13 = pneg %p1208_p12 }
  0x25   : > { %p1214_p2 = pnand %p1212_p0, %p1209_p13 }
  0x27   : > { %1217 = shalt.err (!%p1214_p2)
}
  0x28   : > { %s1218_s14 = scalar_lea.vmem %s221_s12, 2048  ;;  %p1226_p5 = scmp.lt.s32.totalorder %s221_s12, %s221_s12 }
  0x29   : > { %p1219_p4 = scmp.ne.s32.totalorder %s221_s12, %s1218_s14  ;;  %p1227_p1 = scmp.lt.s32.totalorder %s1218_s14, %s1218_s14 }
  0x2b   : > { %p1221_p6 = pnand %p1219_p4, %p1207_p11  ;;  %p1228_p3 = por %p1227_p1, %p1226_p5 }
  0x2d   : > { %p1222_p8 = pneg %p1221_p6 }
  0x2f   : > { %p1229_p7 = pnand %p1228_p3, %p1222_p8 }
  0x31   : > { %1232 = shalt.err (!%p1229_p7)
}
  0x32   : > { %s1397_s16 = smov 128   ;;  %s1398_s17 = smov 8  }
  0x33   : > { %1085 = dma.hbm_to_vmem [thread:$0]  (!%p1514_p9), %s1882_s2, 2048, %s221_s12, [#allocation8], %s1397_s16, %s1397_s16, %s1398_s17  }
  0x34   : > { %s1883_s3 = sld [smem:[#allocation19_spill]] }
  0x3a   : > { %s1233_s11 = scalar_lea.hbm %s1883_s3, 256 }
  0x3b   : > { %p1234_p10 = scmp.ne.s32.totalorder %s1883_s3, %s1233_s11  ;;  %p1240_p5 = scmp.lt.u32.totalorder %s1233_s11, %s1883_s3 }
  0x3d   : > { %p1236_p1 = pnand %p1234_p10, %p1207_p11 }
  0x3f   : > { %p1237_p3 = pneg %p1236_p1 }
  0x41   : > { %p1242_p7 = pnand %p1240_p5, %p1237_p3 }
  0x43   : > { %1245 = shalt.err (!%p1242_p7)
}
  0x44   : > { %s1246_s12 = scalar_lea.vmem %s1518_s15, 256  ;;  %p1254_p2 = scmp.lt.s32.totalorder %s1518_s15, %s1518_s15 }
  0x45   : > { %p1247_p12 = scmp.ne.s32.totalorder %s1518_s15, %s1246_s12  ;;  %p1255_p4 = scmp.lt.s32.totalorder %s1246_s12, %s1246_s12 }
  0x47   : > { %p1249_p13 = pnand %p1247_p12, %p1207_p11  ;;  %p1256_p6 = por %p1255_p4, %p1254_p2 }
  0x49   : > { %p1250_p0 = pneg %p1249_p13 }
  0x4b   : > { %p1257_p8 = pnand %p1256_p6, %p1250_p0 }
  0x4d   : > { %1260 = shalt.err (!%p1257_p8)
}
  0x4e   : > { %s1399_s21 = smov 64   ;;  %s1400_s29 = smov 4  }
  0x4f   : > { %1088 = dma.hbm_to_vmem [thread:$0]  (!%p1514_p9), %s1883_s3, 256, %s1518_s15, [#allocation8], %s1399_s21, %s1399_s21, %s1400_s29  }
  0x50   : > { %s1884_s17 = sadd.s32 4294967295, %s1393_s28   ;;  %s32_s18 = sadd.s32 1, %s1385_s26 }
  0x51   : > { %p195_p11 = scmp.eq.s32.totalorder %s1884_s17, 3  ;;  %p33_p10 = scmp.ge.s32.totalorder %s32_s18, 2 }
  0x52   : > { %s35_s19 = sadd.s32 1, %s1389_s27  ;;  %p51_p1 = scmp.ne.s32.totalorder %s1373_s23, %s1369_s22 }
  0x53   : > { %p52_p3 = scmp.eq.s32.totalorder %s1393_s28, 0  ;;  %s1907_s18 = smov (%p33_p10, %s32_s18), 0 }
  0x54   : > { %1885 = sst [smem:[#allocation16_spill]] %s1907_s18  ;;  %s1909_s19 = smov (!%p33_p10, %s35_s19), %s1389_s27 }
  0x55   : > { %s40_s13 = ssub.s32 %s1385_s26, %s1907_s18  ;;  %s44_s20 = sadd.s32 1, %s1373_s23 }
  0x56   : > { %p37_p5 = scmp.ge.s32.totalorder %s1909_s19, 2  ;;  %p1580_p9 = por %p195_p11, %p51_p1 }
  0x57   : > { %p1584_p7 = por %p52_p3, %p51_p1  ;;  %s253_s11 = sand.u32 1, %s1373_s23  }
  0x58   : > { %s1886_s15 = scalar_select %p1580_p9, 1, 0 }
  0x59   : > { %s1911_s19 = smov (%p37_p5, %s1909_s19), 0  ;;  %p1099_p12 = scmp.lt.s32.totalorder %s1393_s28, 4 }
  0x5a   : > { %1887 = sst [smem:[#allocation17_spill]] %s1886_s15  ;;  %s1006_s14 = sshll.u32 %s253_s11, 2 }
  0x5b   : > { %s39_s12 = ssub.s32 %s1389_s27, %s1911_s19  ;;  %s1007_s29 = sshll.u32 %s1389_s27, 1 }
  0x5c   : > { %s41_s21 = sor.u32 %s40_s13, %s39_s12  ;;  %s262_s9 = sadd.s32 %s1385_s26, %s1007_s29 }
  0x5d   : > { %p42_p13 = scmp.eq.s32.totalorder %s41_s21, 0  ;;  %s1008_s16 = sshll.u32 %s262_s9, 6 }
  0x5e   : > { %s257_s17 = scalar_lea.vmem [#allocation4], %s1006_s14  ;;  %s1602_s15 = scalar_lea.hbm %s1854_s0, %s1008_s16 }
  0x5f   : > { %s266_s2 = sshll.u32 %s257_s17, 4  ;;  %p1610_p0 = pnand %p1099_p12, %p1584_p7  ;;  %s1604_s2 = int_to_ptr.vmem [resolvable:$true] %s266_s2 }
  0x60   : > { %s1597_s3 = scalar_select %p42_p13, %s1373_s23, %s44_s20  }
  0x61   : > { %s254_s20 = scalar_lea.sflag [#allocation5], %s253_s11  ;;  %s1261_s14 = scalar_lea.hbm %s1602_s15, 64 }
  0x62   : > { %p1262_p2 = scmp.ne.s32.totalorder %s1602_s15, %s1261_s14  ;;  %p1263_p4 = pneg %p1610_p0 }
  0x63   : > { %s1266_s30 = scalar_lea.hbm %s1854_s0, 256  ;;  %p1267_p11 = scmp.lt.u32.totalorder %s1602_s15, %s1854_s0 }
  0x64   : > { %p1264_p6 = pnand %p1263_p4, %p1262_p2  ;;  %p1268_p10 = scmp.lt.u32.totalorder %s1266_s30, %s1261_s14 }
  0x65   : > { %p1270_p3 = scmp.lt.u32.totalorder %s1261_s14, %s1602_s15 }
  0x66   : > { %p1265_p8 = pneg %p1264_p6  ;;  %p1269_p1 = por %p1268_p10, %p1267_p11 }
  0x68   : > { %p1271_p5 = por %p1270_p3, %p1269_p1 }
  0x6a   : > { %p1272_p7 = pnand %p1271_p5, %p1265_p8 }
  0x6c   : > { %1275 = shalt.err (!%p1272_p7)
}
  0x6d   : > { %s1276_s11 = scalar_lea.vmem %s1604_s2, 64  ;;  %s1401_s29 = smov [#allocation4]  }
  0x6e   : > { %p1277_p12 = scmp.ne.s32.totalorder %s1604_s2, %s1276_s11  ;;  %s1281_s9 = sshll.u32 %s1401_s29, 4  ;;  %s1282_s9 = int_to_ptr.vmem [resolvable:$false] %s1281_s9 }
  0x6f   : > { %s1283_s16 = scalar_lea.vmem %s1282_s9, 128  ;;  %p1284_p6 = scmp.lt.s32.totalorder %s1604_s2, %s1282_s9 }
  0x70   : > { %p1279_p13 = pnand %p1277_p12, %p1263_p4  ;;  %p1285_p11 = scmp.lt.s32.totalorder %s1283_s16, %s1276_s11 }
  0x72   : > { %p1280_p2 = pneg %p1279_p13  ;;  %p1286_p10 = por %p1285_p11, %p1284_p6 }
  0x74   : > { %p1287_p1 = pnand %p1286_p10, %p1280_p2 }
  0x76   : > { %1290 = shalt.err (!%p1287_p1)
}
  0x77   : > { %1092 = dma.hbm_to_vmem [thread:$0]  (!%p1610_p0), %s1602_s15, 64, %s1604_s2, %s254_s20  }
  0x78   : > { %p1890_p8 = scmp.ne.s32.totalorder %s1880_s10, 0 }
  0x79   : > { %s1642_s17 = sand.u32 (!%p1890_p8), 1, %s1369_s22   ;;  %p1891_p4 = scmp.ne.s32.totalorder (!%p1890_p8), %s1877_s8, 0 }
  0x7a   : > { %286 = sbr.rel (%p1890_p8) target bundleno = 847 (0x34f), region = 44  ;;  %s1010_s14 = sshll.u32 (!%p1890_p8), %s1642_s17, 2 }
  0x7b   : > { %s289_s6 = scalar_lea.sflag (!%p1890_p8), [#allocation5], %s1642_s17  ;;  %s292_s18 = scalar_lea.vmem (!%p1890_p8), [#allocation4], %s1010_s14 }
  0x81   : > { %1352 = dma.done.wait (%p1891_p4), %s289_s6, 64  }
  0x82   : > { %1354 = vsyncadd (%p1891_p4), %s289_s6, 4294967232  ;;  %p1892_p3 = scmp.ne.s32.totalorder %s1876_s7, 0 }
  0x84   : > { %1356 = dma.done.wait (%p1892_p3), [#allocation8], 2304  }
  0x85   : > { %1358 = vsyncadd (%p1892_p3), [#allocation8], 4294964992  ;;  %p337_p0 = scmp.lt.s32.totalorder %s1381_s25, 1  ;;  %p339_p5 = scmp.lt.s32.totalorder %s1377_s24, 1  ;;  %v1402_v0 = vmov 0.0   ;;  %vm1403_vm0 = vmmov 0  }
  0x86   : > { %1050 = vmatprep.subr.bf16.mxu1 %v1402_v0  ;;  %1052 = vmatprep.mubr.msk.bf16.mxu1 %vm1403_vm0, %v1402_v0  ;;  %v348_v1 = vld [vmem:[%s292_s18] sm:$0xf]  ;;  %vm354_vm1 = vcmask 1041408   ;;  %v1180_v4 = vld [vmem:[#allocation7 + $0x4] ss:$8 sps:$4 sm:$0xff]   ;;  %vm350_vm2 = vcmask 31744  }
  0x87   : > { %s338_s2 = scalar_select %p337_p0, %s1381_s25, 1  ;;  %v349_v2 = vpack.c.bf16 %v348_v1, %v348_v1  ;;  %v1182_v6 = vld [vmem:[#allocation7] ss:$8 sps:$4 sm:$0xff]   ;;  %545 = vmatprep.subr.bf16.mxu0 %v1180_v4  ;;  %v1183_v8 = vld [vmem:[#allocation7 + $0x14] ss:$8 sps:$4 sm:$0xff]   ;;  %v1404_v26 = vmov 0  }
  0x88   : > { %s340_s8 = scalar_select %p339_p5, %s1377_s24, 1  ;;  %v347_v9 = vld [vmem:[%s1858_s4] sm:$0xf]  ;;  %546 = vmatpush1.bf16.msra.mxu0 %v1182_v6  ;;  %v1186_v12 = vld [vmem:[#allocation7 + $0x24] ss:$8 sps:$4 sm:$0xff]   ;;  %v462_v22 = vld [vmem:[#allocation7 + $0x70] sm:$0xff]  ;;  %577 = vmatprep.mubr.bf16.mxu0 %v1404_v26 }
  0x89   : > { %s1014_s10 = sshll.u32 %s338_s2, 1  ;;  %v356_v7 = vsel %vm354_vm1, %v349_v2, 0  ;;  %547 = vmatprep.subr.bf16.mxu0 %v1183_v8  ;;  %v1185_v11 = vld [vmem:[#allocation7 + $0x10] ss:$8 sps:$4 sm:$0xff]   ;;  %v1188_v13 = vld [vmem:[#allocation7 + $0x20] ss:$8 sps:$4 sm:$0xff]   ;;  %1179 = vset.pattern.permute.xlu0 %v1404_v26 }
  0x8a   : > { %s342_s15 = sadd.s32 %s1014_s10, %s340_s8  ;;  %1051 = vmatpush3.bf16.msra.mxu1 %v356_v7  ;;  %v1189_v14 = vld [vmem:[#allocation7 + $0x34] ss:$8 sps:$4 sm:$0xff]   ;;  %v1191_v15 = vld [vmem:[#allocation7 + $0x30] ss:$8 sps:$4 sm:$0xff]   ;;  %v1192_v16 = vld [vmem:[#allocation7 + $0x44] ss:$8 sps:$4 sm:$0xff]  }
  0x8b   : > { %s1015_s13 = sshll.u32 %s342_s15, 2  ;;  %1056 = vmatprep.subr.bf16.mxu1 %v1402_v0  ;;  %v1194_v17 = vld [vmem:[#allocation7 + $0x40] ss:$8 sps:$4 sm:$0xff]   ;;  %v1195_v18 = vld [vmem:[#allocation7 + $0x54] ss:$8 sps:$4 sm:$0xff]   ;;  %vm446_vm3 = vcmask 257024  }
  0x8c   : > { %s344_s30 = scalar_lea.vmem %s1855_s1, %s1015_s13  ;;  %548 = vmatpush1.bf16.msra.mxu0 %v1185_v11  ;;  %v1197_v19 = vld [vmem:[#allocation7 + $0x50] ss:$8 sps:$4 sm:$0xff]   ;;  %v1198_v20 = vld [vmem:[#allocation7 + $0x64] ss:$8 sps:$4 sm:$0xff]   ;;  %v1200_v21 = vld [vmem:[#allocation7 + $0x60] ss:$8 sps:$4 sm:$0xff]  }
  0x8d   : > { %v400_v3 = vld [vmem:[%s344_s30] sm:$0xf]  ;;  %1053 = vmatmul.mubr.msk.bf16.vlgmr.msra.gmra.mrb[0].mxu1 %vm350_vm2, %v347_v9  ;;  %549 = vmatprep.subr.bf16.mxu0 %v1186_v12  ;;  %v1201_v24 = vld [vmem:[#allocation7 + $0x74] ss:$8 sps:$4 sm:$0xff]   ;;  %v1203_v27 = vld [vmem:[#allocation9] sm:$0xff]   ;;  %vm605_vm4 = vcmask 261120  }
  0x8e   : > { %v401_v5 = vpack.c.bf16 %v400_v3, %v400_v3  ;;  %1058 = vmatprep.mubr.msk.bf16.mxu1 %vm1403_vm0, %v1402_v0  ;;  %v463_v23 = vld [vmem:[#allocation7 + $0x78] sm:$0xff]  ;;  %v1204_v28 = vld [vmem:[#allocation9 + $0x8] sm:$0xff]   ;;  %s1405_s9 = smov 96   ;;  %vm649_vm5 = vcmask 523264   ;;  %s1013_s16 = sshll.u32 %s1642_s17, 5  ;;  %vm677_vm6 = vcmask 523520  }
  0x8f   : > { %v1032_v25 = vcombine.low %v462_v22, %v463_v23  ;;  %v651_v29 = vld [vmem:[%s1859_s5] sm:$0xff]  ;;  %s1717_s14 = scalar_lea.vmem [#allocation10], %s1013_s16  ;;  %s1406_s6 = smov 64   ;;  %vm700_vm7 = vcmask 785920   ;;  %vm706_vm8 = vcmask 1048320  }
  0x90   : > { %v403_v10 = vsel %vm354_vm1, %v401_v5, 0  ;;  %550 = vmatpush1.bf16.msra.mxu0 %v1188_v13  ;;  %654 = vperm.xlu0 %1179, %v651_v29   ;;  %s1407_s18 = smov 32   ;;  %s1038_s2 = sshll.u32 %s1377_s24, 2 }
  0x91   : > { %1057 = vmatpush3.bf16.msra.mxu1 %v403_v10  ;;  %551 = vmatprep.subr.bf16.mxu0 %v1189_v14  ;;  %s1039_s8 = sshll.u32 %s1381_s25, 3  ;;  %s877_s25 = sshll.u32 %s1717_s14, 4  ;;  %s1798_s25 = int_to_ptr.vmem [resolvable:$true] %s877_s25 }
  0x92   : > { %1062 = vmatprep.subr.bf16.mxu1 %v1402_v0  ;;  %s873_s10 = sadd.s32 %s1039_s8, %s1038_s2  ;;  %s1894_s20 = sld [smem:[#allocation20_spill]] }
  0x93   : > { %s1040_s24 = sshll.u32 %s873_s10, 7  ;;  %s861_s12 = scalar_lea.sflag [#allocation6], %s1642_s17 }
  0x94   : > { %552 = vmatpush1.bf16.msra.mxu0 %v1191_v15  ;;  %s1291_s21 = scalar_lea.vmem %s1798_s25, 512  ;;  %s1408_s11 = smov [#allocation10]  }
  0x95   : > { %1059 = vmatmul.mubr.msk.bf16.vlgmr.msra.gmra.mrb[4].mxu1 %vm350_vm2, %v347_v9  ;;  %553 = vmatprep.subr.bf16.mxu0 %v1192_v16  ;;  %p1292_p7 = scmp.ne.s32.totalorder %s1798_s25, %s1291_s21  ;;  %s1295_s29 = sshll.u32 %s1408_s11, 4  ;;  %s1296_s29 = int_to_ptr.vmem [resolvable:$false] %s1295_s29 }
  0x96   : > { %1066 = vmatprep.mubr.msk.bf16.mxu1 %vm1403_vm0, %v1402_v0  ;;  %1063 = vmatpush3.bf16.msra.mxu1 %v1203_v27  ;;  %p1298_p2 = scmp.lt.s32.totalorder %s1798_s25, %s1296_s29 }
  0x97   : > { %1064 = vmatprep.subr.bf16.mxu1 %v1402_v0  ;;  %p1293_p12 = pnand %p1292_p7, %p1580_p9 }
  0x98   : > { %554 = vmatpush1.bf16.msra.mxu0 %v1194_v17  ;;  %s1796_s30 = scalar_lea.hbm %s1894_s20, %s1040_s24 }
  0x99   : > { %555 = vmatprep.subr.bf16.mxu0 %v1195_v18  ;;  %p1294_p13 = pneg %p1293_p12 }
  0x9a   : > { %1065 = vmatpush3.bf16.msra.mxu1 %v1204_v28 }
  0x9c   : > { %556 = vmatpush1.bf16.msra.mxu0 %v1197_v19 }
  0x9d   : > { %557 = vmatprep.subr.bf16.mxu0 %v1198_v20 }
  0xa0   : > { %558 = vmatpush1.bf16.msra.mxu0 %v1200_v21 }
  0xa1   : > { %559 = vmatprep.subr.bf16.mxu0 %v1201_v24 }
  0xa4   : > { %560 = vmatpush1.bf16.msra.mxu0 %v1032_v25 }
 0x10f   : > { %v1704_v56 = vpop.permute.xlu0 %654 }
 0x160   : > { %v392_v30 = vpop.f32.mrb[0].mxu1 }
 0x161   : > { %v398_v31 = vpack.c.bf16 %v392_v30, %v392_v30  ;;  %v1054_v32 = vpop.f32.mrb[1].mxu1 }
 0x162   : > { %v395_v33 = vpop.f32.mrb[2].mxu1 }
 0x163   : > { %399 = vst [vmem:[#allocation2] sm:$0xf] %v398_v31  ;;  %v1055_v34 = vpop.f32.mrb[3].mxu1 }
 0x168   : > { %v439_v35 = vpop.f32.mrb[4].mxu1 }
 0x169   : > { %v445_v36 = vpack.c.bf16 %v439_v35, %v439_v35  ;;  %v1060_v37 = vpop.f32.mrb[5].mxu1 }
 0x16a   : > { %v464_v38 = vld [vmem:[#allocation2] sm:$0xf]  ;;  %v442_v39 = vpop.f32.mrb[6].mxu1 }
 0x16b   : > { %447 = vst.msk [vmem:[#allocation2 + $0x4] sm:$0xf] %vm446_vm3, %v445_v36  ;;  %578 = vmatmul.mubr.bf16.vlgmr.msra.gmra.mrb[0].mxu0 %v464_v38  ;;  %v1061_v40 = vpop.f32.mrb[7].mxu1 }
 0x172   : > { %v588_v41 = vld [vmem:[#allocation2 + $0x4] sm:$0xf] }
 0x173   : > { %1067 = vmatmul.mubr.msk.bf16.vlgmr.msra.gmra.mrb[8].mxu1 %vm605_vm4, %v588_v41 }
 0x23e   : > { %v579_v42 = vpop.f32.mrb[0].mxu0 }
 0x23f   : > { %v581_v43 = vpop.f32.mrb[1].mxu0  ;;  %v1680_v44 = vmul.f32 0.75, %v579_v42  ;;  %v1682_v45 = vmul.f32 0.25, %v579_v42 }
 0x240   : > { %v583_v46 = vpop.f32.mrb[2].mxu0  ;;  %v1688_v48 = vmul.f32 0.75, %v581_v43  ;;  %v1698_v53 = vmul.f32 0.25, %v581_v43 }
 0x241   : > { %v584_v47 = vpop.f32.mrb[3].mxu0  ;;  %712 = vrot.lane.b32.xlu0 %v1680_v44, %s1405_s9  ;;  %719 = vrot.lane.b32.xlu1 %v1682_v45, %s1405_s9 }
 0x245   : > { %666 = vrot.lane.b32.xlu0 %v1682_v45, %s1405_s9  ;;  %761 = vrot.lane.b32.xlu1 %v1688_v48, %s1405_s9 }
 0x246   : > { %v643_v49 = vpop.f32.mrb[8].mxu1 }
 0x247   : > { %650 = vst.msk [vmem:[#allocation3 + $0x10] sm:$0xff] %vm649_vm5, %v643_v49  ;;  %v1068_v50 = vpop.f32.mrb[9].mxu1 }
 0x248   : > { %v646_v51 = vpop.f32.mrb[10].mxu1 }
 0x249   : > { %683 = vrot.lane.b32.xlu0 %v1680_v44, %s1405_s9  ;;  %816 = vrot.lane.b32.xlu1 %v1688_v48, %s1405_s9  ;;  %v1069_v52 = vpop.f32.mrb[11].mxu1 }
 0x24d   : > { %769 = vrot.lane.b32.xlu0 %v1698_v53, %s1405_s9  ;;  %823 = vrot.lane.b32.xlu1 %v1698_v53, %s1405_s9 }
 0x24e   : > { %v840_v54 = vld [vmem:[#allocation3 + $0x10] sm:$0xff] }
 0x24f   : > { %v850_v55 = vmul.f32 0.25, %v840_v54 }
 0x251   : > { %690 = vrot.lane.b32.xlu0 %v1682_v45, %s1405_s9  ;;  %789 = vrot.lane.b32.xlu1 %v1688_v48, %s1405_s9  ;;  %v661_v57 = vadd.f32 %v850_v55, %v1680_v44 }
 0x253   : > { %v662_v58 = vadd.f32 %v661_v57, %v1704_v56 }
 0x255   : > { %740 = vrot.lane.b32.xlu0 %v1680_v44, %s1405_s9  ;;  %796 = vrot.lane.b32.xlu1 %v1698_v53, %s1405_s9  ;;  %v663_v59 = vmax.f32 %v662_v58, 0.0 }
 0x257   : > { %672 = vst.msk [vmem:[%s1717_s14] sm:$0xff] %vm605_vm4, %v663_v59 }
 0x259   : > { %844 = vrot.lane.b32.xlu1 %v1688_v48, %s1405_s9  ;;  %748 = vrot.lane.b32.xlu0 %v1698_v53, %s1405_s9 }
 0x25d   : > { %852 = vrot.lane.b32.xlu1 %v850_v55, %s1406_s6 }
 0x2b3   : > { %v713_v60 = vpop.permute.xlu0 %712  ;;  %v720_v61 = vpop.permute.xlu1 %719 }
 0x2b4   : > { %v715_v62 = vadd.f32 %v713_v60, %v1682_v45  ;;  %v722_v63 = vadd.f32 %v720_v61, %v1680_v44 }
 0x2b6   : > { %v716_v0 = vadd.f32 %v715_v62, %v1704_v56  ;;  %v723_v4 = vadd.f32 %v722_v63, %v1704_v56 }
 0x2b7   : > { %v667_v1 = vpop.permute.xlu0 %666  ;;  %v762_v2 = vpop.permute.xlu1 %761 }
 0x2b8   : > { %v717_v3 = vmax.f32 %v716_v0, 0.0  ;;  %v669_v5 = vadd.f32 %v1680_v44, %v667_v1  ;;  %v764_v7 = vadd.f32 %v762_v2, %v1682_v45  ;;  %v724_v10 = vmax.f32 %v723_v4, 0.0 }
 0x2ba   : > { %v670_v6 = vadd.f32 %v669_v5, %v1704_v56  ;;  %726 = vrot.lane.b32.xlu0 %v717_v3, %s1405_s9  ;;  %v765_v16 = vadd.f32 %v764_v7, %v1704_v56 }
 0x2bb   : > { %v684_v8 = vpop.permute.xlu0 %683  ;;  %v817_v9 = vpop.permute.xlu1 %816 }
 0x2bc   : > { %v671_v11 = vmax.f32 %v670_v6, 0.0  ;;  %v686_v12 = vadd.f32 %v1682_v45, %v684_v8  ;;  %v819_v13 = vadd.f32 %v817_v9, %v1698_v53  ;;  %v766_v24 = vmax.f32 %v765_v16, 0.0 }
 0x2be   : > { %v687_v14 = vadd.f32 %v686_v12, %v1704_v56  ;;  %v820_v15 = vadd.f32 %v819_v13, %v1704_v56  ;;  %731 = vrot.lane.b32.xlu0 %v724_v10, %s1405_s9  ;;  %674 = vrot.lane.b32.xlu1 %v671_v11, %s1407_s18 }
 0x2bf   : > { %v770_v17 = vpop.permute.xlu0 %769  ;;  %v824_v18 = vpop.permute.xlu1 %823 }
 0x2c0   : > { %v688_v19 = vmax.f32 %v687_v14, 0.0  ;;  %v821_v20 = vmax.f32 %v820_v15, 0.0  ;;  %v772_v21 = vadd.f32 %v770_v17, %v1688_v48  ;;  %v826_v22 = vadd.f32 %v824_v18, %v1688_v48 }
 0x2c2   : > { %v827_v23 = vadd.f32 %v826_v22, %v1704_v56  ;;  %830 = vrot.lane.b32.xlu0 %v821_v20, %s1405_s9  ;;  %697 = vrot.lane.b32.xlu1 %v688_v19, %s1406_s6  ;;  %v773_v27 = vadd.f32 %v772_v21, %v1704_v56 }
 0x2c3   : > { %v691_v25 = vpop.permute.xlu0 %690  ;;  %v790_v26 = vpop.permute.xlu1 %789 }
 0x2c4   : > { %v828_v28 = vmax.f32 %v827_v23, 0.0  ;;  %v693_v29 = vadd.f32 %v1680_v44, %v691_v25  ;;  %v792_v30 = vadd.f32 %v790_v26, %v1698_v53  ;;  %v774_v33 = vmax.f32 %v773_v27, 0.0 }
 0x2c6   : > { %v793_v31 = vadd.f32 %v792_v30, %v1704_v56  ;;  %835 = vrot.lane.b32.xlu0 %v828_v28, %s1405_s9  ;;  %776 = vrot.lane.b32.xlu1 %v766_v24, %s1407_s18  ;;  %v694_v34 = vadd.f32 %v693_v29, %v1704_v56  ;;  %s1297_s9 = scalar_lea.vmem %s1296_s29, 1024 }
 0x2c7   : > { %v797_v32 = vpop.permute.xlu1 %796  ;;  %v741_v40 = vpop.permute.xlu0 %740  ;;  %p1299_p6 = scmp.lt.s32.totalorder %s1297_s9, %s1291_s21 }
 0x2c8   : > { %v794_v35 = vmax.f32 %v793_v31, 0.0  ;;  %v799_v36 = vadd.f32 %v797_v32, %v1688_v48  ;;  %v695_v38 = vmax.f32 %v694_v34, 0.0  ;;  %v743_v43 = vadd.f32 %v741_v40, %v1682_v45 }
 0x2c9   : > { %p1300_p11 = por %p1299_p6, %p1298_p2 }
 0x2ca   : > { %v800_v37 = vadd.f32 %v799_v36, %v1704_v56  ;;  %803 = vrot.lane.b32.xlu0 %v794_v35, %s1406_s6  ;;  %781 = vrot.lane.b32.xlu1 %v774_v33, %s1407_s18  ;;  %v744_v47 = vadd.f32 %v743_v43, %v1704_v56 }
 0x2cb   : > { %v845_v41 = vpop.permute.xlu1 %844  ;;  %v749_v42 = vpop.permute.xlu0 %748  ;;  %p1301_p10 = pnand %p1300_p11, %p1294_p13 }
 0x2cc   : > { %v801_v39 = vmax.f32 %v800_v37, 0.0  ;;  %v751_v46 = vadd.f32 %v749_v42, %v1680_v44  ;;  %v745_v52 = vmax.f32 %v744_v47, 0.0  ;;  %v847_v45 = vadd.f32 %v845_v41, %v1698_v53 }
 0x2ce   : > { %808 = vrot.lane.b32.xlu0 %v801_v39, %s1406_s6  ;;  %703 = vrot.lane.b32.xlu1 %v695_v38, %s1406_s6  ;;  %v752_v51 = vadd.f32 %v751_v46, %v1704_v56  ;;  %v848_v53 = vadd.f32 %v847_v45, %v1704_v56 }
 0x2cf   : > { %v853_v49 = vpop.permute.xlu1 %852 }
 0x2d0   : > { %v753_v55 = vmax.f32 %v752_v51, 0.0  ;;  %v855_v57 = vadd.f32 %v853_v49, %v1688_v48  ;;  %v849_v48 = vmax.f32 %v848_v53, 0.0 }
 0x2d2   : > { %v856_v60 = vadd.f32 %v855_v57, %v1704_v56 }
 0x2d4   : > { %v857_v63 = vmax.f32 %v856_v60, 0.0 }
 0x32c   : > { %v727_v50 = vpop.permute.xlu0 %726 }
 0x32d   : > { %729 = vst.msk [vmem:[%s1717_s14 + $0x8] sm:$0xff] %vm605_vm4, %v727_v50 }
 0x330   : > { %v732_v44 = vpop.permute.xlu0 %731  ;;  %v675_v54 = vpop.permute.xlu1 %674 }
 0x331   : > { %734 = vst.msk [vmem:[%s1717_s14 + $0x8] sm:$0xff] %vm677_vm6, %v732_v44  ;;  %678 = vst.msk [vmem:[%s1717_s14] sm:$0xff] %vm677_vm6, %v675_v54 }
 0x332   : > { %754 = vst.msk [vmem:[%s1717_s14 + $0x8] sm:$0xff] %vm700_vm7, %v745_v52 }
 0x333   : > { %755 = vst.msk [vmem:[%s1717_s14 + $0x8] sm:$0xff] %vm706_vm8, %v753_v55 }
 0x334   : > { %v831_v58 = vpop.permute.xlu0 %830  ;;  %v698_v59 = vpop.permute.xlu1 %697 }
 0x335   : > { %833 = vst.msk [vmem:[%s1717_s14 + $0x18] sm:$0xff] %vm605_vm4, %v831_v58 }
 0x336   : > { %701 = vst.msk [vmem:[%s1717_s14] sm:$0xff] %vm700_vm7, %v698_v59 }
 0x338   : > { %v836_v61 = vpop.permute.xlu0 %835  ;;  %v777_v62 = vpop.permute.xlu1 %776 }
 0x339   : > { %838 = vst.msk [vmem:[%s1717_s14 + $0x18] sm:$0xff] %vm677_vm6, %v836_v61 }
 0x33a   : > { %779 = vst.msk [vmem:[%s1717_s14 + $0x10] sm:$0xff] %vm605_vm4, %v777_v62 }
 0x33b   : > { %858 = vst.msk [vmem:[%s1717_s14 + $0x18] sm:$0xff] %vm700_vm7, %v849_v48 }
 0x33c   : > { %859 = vst.msk [vmem:[%s1717_s14 + $0x18] sm:$0xff] %vm706_vm8, %v857_v63  ;;  %v804_v56 = vpop.permute.xlu0 %803  ;;  %v782_v0 = vpop.permute.xlu1 %781 }
 0x33d   : > { %784 = vst.msk [vmem:[%s1717_s14 + $0x10] sm:$0xff] %vm677_vm6, %v782_v0 }
 0x33e   : > { %806 = vst.msk [vmem:[%s1717_s14 + $0x10] sm:$0xff] %vm700_vm7, %v804_v56 }
 0x340   : > { %v809_v1 = vpop.permute.xlu0 %808  ;;  %v704_v2 = vpop.permute.xlu1 %703 }
 0x341   : > { %811 = vst.msk [vmem:[%s1717_s14 + $0x10] sm:$0xff] %vm706_vm8, %v809_v1  ;;  %707 = vst.msk [vmem:[%s1717_s14] sm:$0xff] %vm706_vm8, %v704_v2 }
 0x342   : > { %1304 = shalt.err (!%p1301_p10)
}
 0x343   : > { %s1305_s17 = scalar_lea.hbm %s1796_s30, 512  ;;  %s1309_s6 = scalar_lea.hbm %s1894_s20, 2048 }
 0x344   : > { %p1306_p1 = scmp.ne.s32.totalorder %s1796_s30, %s1305_s17  ;;  %p1310_p3 = scmp.lt.u32.totalorder %s1796_s30, %s1894_s20 }
 0x345   : > { %p1311_p0 = scmp.lt.u32.totalorder %s1309_s6, %s1305_s17  ;;  %p1313_p7 = scmp.lt.u32.totalorder %s1305_s17, %s1796_s30 }
 0x346   : > { %p1307_p8 = pnand %p1306_p1, %p1580_p9 }
 0x347   : > { %p1312_p5 = por %p1311_p0, %p1310_p3 }
 0x348   : > { %p1308_p4 = pneg %p1307_p8 }
 0x349   : > { %p1314_p12 = por %p1313_p7, %p1312_p5 }
 0x34b   : > { %p1315_p13 = pnand %p1314_p12, %p1308_p4 }
 0x34d   : > { %1318 = shalt.err (!%p1315_p13)
}
 0x34e   : > { %1080 = dma.vmem_to_hbm [thread:$0]  (%p1580_p9), %s1798_s25, 512, %s1796_s30, %s861_s12  }
 0x34f PF: > { %s1895_s8 = sld [smem:[#allocation14_spill]]  ;;  %s1896_s10 = sld [smem:[#allocation15_spill]] }
 0x350   : > { %p1102_p2 = scmp.ge.s32.totalorder %s1393_s28, 2 }
 0x355   : > { %s889_s24 = sand.u32 1, %s1895_s8   ;;  %p1897_p6 = scmp.ne.s32.totalorder %s1896_s10, 0 }
 0x356   : > { %s890_s13 = scalar_lea.sflag [#allocation6], %s889_s24 }
 0x357   : > { %p1094_p11 = pnand %p1102_p2, %p1897_p6 }
 0x359   : > { %1360 = dma.done.wait (!%p1094_p11), %s890_s13, 512  }
 0x35a   : > { %1362 = vsyncadd (!%p1094_p11), %s890_s13, 4294966784  ;;  %s23_s28 = sadd.s32 1, %s1393_s28   ;;  %s1898_s15 = sld [smem:[#allocation16_spill]] }
 0x35b   : > { %p20_p10 = scmp.ge.s32.totalorder %s23_s28, 6   ;;  %s1899_s21 = smov %s1369_s22 }
 0x35c   : > { %s1900_s22 = smov %s1373_s23  ;;  %s1901_s23 = smov %s1597_s3 }
 0x35d   : > { %s1902_s24 = smov %s1385_s26  ;;  %s1903_s25 = smov %s1389_s27 }
 0x35e   : > { %s1905_s27 = smov %s1911_s19  ;;  %22 = sbr.rel (!%p20_p10) target bundleno = 12 (0xc), region = 100 }
 0x360   : > { %s1904_s26 = smov %s1898_s15 }
 0x365   :  { %895 = vsyncpa [#allocation5], 1 }
 0x366   :  { %897 = vsyncpa [#allocation5 + $0x1], 1 }
 0x367   :  { %898 = vsyncpa [#allocation8], 1 }
 0x368   :  { %899 = vsyncpa [#allocation6], 1 }
 0x369   :  { %901 = vsyncpa [#allocation6 + $0x1], 1 }

</bundles_post_ra>
